<compile_context>
chip_gen: v5e
topology: v5e:2x2
jax: 0.10.0
libtpu: 0.0.40
codegen_flags: <defaults>
</compile_context>

<pallas_src>
import functools

import jax
import jax.numpy as jnp
from jax.experimental import pallas as pl
from jax.experimental.pallas import tpu as pltpu

_LANE = 128
_HW_UNIT = 4096  # 32 sublanes x 128 lanes: valid tiling for f32 / bf16 / int8 blocks


def _round_up(n, m):
    return ((n + m - 1) // m) * m


def _vmem_budget_bytes():
    """Generation-aware VMEM budget (half of physical, capped)."""
    cap = 0
    try:
        cap = int(getattr(pltpu.get_tpu_info(), "vmem_capacity_bytes", 0))
    except Exception:
        cap = 0
    if cap <= 0:
        cap = 64 * 1024 * 1024  # safe lower bound (v7x physical VMEM)
    return min(cap // 2, 96 * 1024 * 1024)


def _dice_partial_kernel(x_ref, y_ref, o_ref, *, fuse_softmax, mask_pad):
    """One (batch, split) partial dice reduction, streamed over spatial tiles.

    x_ref : (1, C, R, 128) f32/bf16 prediction tile (spatial on sublanes+lanes)
    y_ref : (1, 1, R, 128) int8/int32 labels (pad value -1 never matches)
    o_ref : (1, 1, 2, C)   f32 resident accumulator: row0 = intersect, row1 = sum_pred
    """
    @pl.when(pl.program_id(2) == 0)
    def _init():
        o_ref[...] = jnp.zeros_like(o_ref)

    x = x_ref[0].astype(jnp.float32)          # (C, R, 128)
    y = y_ref[0].astype(jnp.int32)            # (1, R, 128)
    c = x.shape[0]

    if fuse_softmax:
        # Softmax over the class axis (major dim): pure VALU/EUP, no cross-lane work.
        m = jnp.max(x, axis=0, keepdims=True)
        e = jnp.exp(x - m)
        x = e / jnp.sum(e, axis=0, keepdims=True)
        if mask_pad:
            # Spatial padding carries label -1; zero its (otherwise 1/C) probs.
            x = jnp.where(y >= 0, x, 0.0)

    ch = jax.lax.broadcasted_iota(jnp.int32, x.shape, 0)   # class index per plane
    match = ch == y                                        # (C, R, 128) bool

    masked = jnp.where(match, x, 0.0)
    # Per-step reductions (lane reduce on the XLU, then a tiny sublane reduce);
    # no big (C, tile) accumulators, so no per-vreg accumulator loads/stores.
    i_part = jnp.sum(jnp.sum(masked, axis=-1), axis=-1)    # (C,)
    p_part = jnp.sum(jnp.sum(x, axis=-1), axis=-1)         # (C,)

    part = jnp.concatenate(
        [i_part.reshape(1, c), p_part.reshape(1, c)], axis=0).reshape(1, 1, 2, c)
    o_ref[...] += part


def soft_dice_loss(x, y, *, apply_nonlin=None, softmax_nonlin=False,
                   batch_dice=False, do_bg=True, smooth=1.0,
                   max_tile_elems=None):
    """MemoryEfficientSoftDiceLoss forward (label-index targets, no loss_mask).

    x: (B, C, *spatial) float predictions (f32 or bf16).
    y: (B, *spatial) or (B, 1, *spatial) integer class labels.
    softmax_nonlin=True fuses a channel softmax into the kernel (the standard
    nnU-Net apply_nonlin); a generic `apply_nonlin` callable is applied outside.
    Returns the scalar -dc.mean().
    """
    x = jnp.asarray(x)
    if x.dtype != jnp.float32 and x.dtype != jnp.bfloat16:
        x = x.astype(jnp.float32)
    if apply_nonlin is not None and not softmax_nonlin:
        x = apply_nonlin(x)

    B, C = int(x.shape[0]), int(x.shape[1])
    x_flat = x.reshape(B, C, -1)
    HW = int(x_flat.shape[-1])

    y = jnp.asarray(y)
    if y.size != B * HW:
        # TODO(synk): y-already-one-hot branch (y.shape == x.shape) not implemented.
        raise NotImplementedError("soft_dice_loss expects integer label maps.")
    y_idx = y.reshape(B, HW)

    label_dtype = jnp.int8 if C <= 127 else jnp.int32
    y_flat = y_idx.astype(label_dtype).reshape(B, 1, HW)

    # ---- generation-aware tile sizing from a VMEM budget --------------------
    vmem_budget = _vmem_budget_bytes()
    x_bytes = jnp.dtype(x_flat.dtype).itemsize
    label_bytes = jnp.dtype(label_dtype).itemsize
    # Generous per-element estimate: double-buffered input blocks plus full-tile
    # f32 temporaries (iota / match / select / softmax exp) the compiler may hold.
    per_elem = C * (2 * x_bytes + 16) + 2 * label_bytes + 16
    usable = max(vmem_budget - (2 << 20), _HW_UNIT * per_elem)
    tile_max = max(_HW_UNIT, min(usable // per_elem, 512 * 1024))
    if max_tile_elems is not None:
        tile_max = max(_HW_UNIT, min(tile_max, int(max_tile_elems)))
    tile_max = (tile_max // _HW_UNIT) * _HW_UNIT

    # ---- megacore split: give both TensorCores work when B is 1 or odd ------
    nsplit = 2 if (B % 2 == 1) else 1

    # ---- choose (tile, steps): hw_pad = nsplit * s_per * tile, preferring an
    #      exact fit so large inputs need no jnp.pad copy -----------------------
    n_units = -(-HW // _HW_UNIT)
    min_chunks = max(nsplit, -(-n_units // (tile_max // _HW_UNIT)))
    chunks = _round_up(min_chunks, nsplit)
    for cand in range(chunks, chunks + 4 * nsplit + 1, nsplit):
        if n_units % cand == 0:
            chunks = cand
            break
    t_units = -(-n_units // chunks)
    tile = t_units * _HW_UNIT
    s_per = chunks // nsplit
    hw_pad = chunks * tile

    if hw_pad != HW:
        # x pads contribute 0 to every sum (masked explicitly in the fused-softmax
        # path); the label pad (-1) never matches a class index.
        x_flat = jnp.pad(x_flat, ((0, 0), (0, 0), (0, hw_pad - HW)))
        y_flat = jnp.pad(y_flat, ((0, 0), (0, 0), (0, hw_pad - HW)),
                         constant_values=-1)

    rows = hw_pad // _LANE
    r_tile = tile // _LANE
    x4 = x_flat.reshape(B, C, rows, _LANE)   # spatial folded onto (sublane, lane)
    y4 = y_flat.reshape(B, 1, rows, _LANE)

    spatial_map = lambda b, p, s: (b, 0, p * s_per + s, 0)
    kernel = functools.partial(
        _dice_partial_kernel,
        fuse_softmax=bool(softmax_nonlin),
        mask_pad=bool(softmax_nonlin) and (hw_pad != HW))

    parts = pl.pallas_call(
        kernel,
        out_shape=jax.ShapeDtypeStruct((B, nsplit, 2, C), jnp.float32),
        grid_spec=pltpu.PrefetchScalarGridSpec(
            num_scalar_prefetch=0,
            grid=(B, nsplit, s_per),
            in_specs=[
                pl.BlockSpec((1, C, r_tile, _LANE), spatial_map),   # predictions
                pl.BlockSpec((1, 1, r_tile, _LANE), spatial_map),   # labels (int8)
            ],
            out_specs=pl.BlockSpec((1, 1, 2, C), lambda b, p, s: (b, p, 0, 0)),
        ),
        compiler_params=pltpu.CompilerParams(
            dimension_semantics=("parallel", "parallel", "arbitrary"),
            vmem_limit_bytes=int(vmem_budget)),
    )(x4, y4)

    parts = parts.sum(axis=1)                  # combine spatial splits -> (B, 2, C)
    intersect, sum_pred = parts[:, 0, :], parts[:, 1, :]

    # sum_gt depends only on labels: compute it outside the kernel hot loop.
    classes = jnp.arange(C, dtype=jnp.int32)
    sum_gt = jnp.sum(
        y_idx.astype(jnp.int32)[:, None, :] == classes[None, :, None],
        axis=-1).astype(jnp.float32)           # (B, C)

    if not do_bg:
        intersect, sum_pred, sum_gt = intersect[:, 1:], sum_pred[:, 1:], sum_gt[:, 1:]
    if batch_dice:
        intersect, sum_pred, sum_gt = intersect.sum(0), sum_pred.sum(0), sum_gt.sum(0)

    dc = (2.0 * intersect + smooth) / jnp.maximum(sum_gt + sum_pred + smooth, 1e-8)
    # TODO(synk): loss_mask (masked reductions) and ddp (all-reduce) paths not implemented.
    return -jnp.mean(dc)


def _reference_loss(x, y, *, apply_nonlin=None, batch_dice=False, do_bg=True,
                    smooth=1.0):
    """Plain-JAX reference mirroring the PyTorch forward."""
    x = jnp.asarray(x, jnp.float32)
    if apply_nonlin is not None:
        x = apply_nonlin(x)
    B, C = x.shape[0], x.shape[1]
    x2 = x.reshape(B, C, -1)
    y2 = jnp.asarray(y).reshape(B, -1)
    y_onehot = jax.nn.one_hot(y2, C, axis=1, dtype=x2.dtype)   # (B, C, HW)
    if not do_bg:
        x2, y_onehot = x2[:, 1:], y_onehot[:, 1:]
    intersect = jnp.sum(x2 * y_onehot, axis=-1)
    sum_pred = jnp.sum(x2, axis=-1)
    sum_gt = jnp.sum(y_onehot, axis=-1)
    if batch_dice:
        intersect, sum_pred, sum_gt = intersect.sum(0), sum_pred.sum(0), sum_gt.sum(0)
    dc = (2.0 * intersect + smooth) / jnp.maximum(sum_gt + sum_pred + smooth, 1e-8)
    return -jnp.mean(dc)


if __name__ == "__main__":
    key = jax.random.PRNGKey(0)
    # (B, C, spatial, fused_softmax, bf16, do_bg, batch_dice, max_tile, tol)
    cases = [
        (2, 4, (16, 16),   False, False, True,  False, None, 1e-5),  # module demo shape
        (2, 3, (160, 160), False, False, True,  False, 4096, 1e-5),  # streaming + tail pad
        (1, 5, (128, 128), False, False, True,  False, None, 1e-5),  # B=1 -> megacore split
        (3, 4, (32, 32),   True,  False, False, True,  None, 3e-5),  # fused softmax, do_bg/batch_dice
        (2, 4, (32, 32),   False, True,  True,  False, None, 1e-4),  # bf16 predictions
    ]
    for (B, C, spatial, fused, bf16, do_bg, bdice, mt, tol) in cases:
        key, kx, ky = jax.random.split(key, 3)
        logits = jax.random.normal(kx, (B, C) + spatial, dtype=jnp.float32)
        y = jax.random.randint(ky, (B,) + spatial, 0, C, dtype=jnp.int32)

        if fused:
            loss = soft_dice_loss(logits, y, softmax_nonlin=True, do_bg=do_bg,
                                  batch_dice=bdice, max_tile_elems=mt)
            ref = _reference_loss(logits, y,
                                  apply_nonlin=lambda v: jax.nn.softmax(v, axis=1),
                                  do_bg=do_bg, batch_dice=bdice)
        else:
            probs = jax.nn.softmax(logits, axis=1)
            x_in = probs.astype(jnp.bfloat16) if bf16 else probs
            loss = soft_dice_loss(x_in, y, do_bg=do_bg, batch_dice=bdice,
                                  max_tile_elems=mt)
            ref = _reference_loss(x_in.astype(jnp.float32), y,
                                  do_bg=do_bg, batch_dice=bdice)

        loss = jax.block_until_ready(loss)
        ref = jax.block_until_ready(ref)
        assert jnp.allclose(loss, ref, atol=tol, rtol=tol), (
            B, C, spatial, float(loss), float(ref))

    print("KERNEL_OK")
</pallas_src>

<mosaic_0001>
module attributes {stable_mosaic.version = 11 : i64} {
  func.func @_dice_partial_kernel(%arg0: i32, %arg1: i32, %arg2: i32, %arg3: memref<1x4x32x128xf32, #tpu.memory_space<vmem>>, %arg4: memref<1x1x32x128xi8, #tpu.memory_space<vmem>>, %arg5: memref<1x1x2x4xf32, #tpu.memory_space<vmem>>) attributes {dimension_semantics = [#tpu.dimension_semantics<parallel>, #tpu.dimension_semantics<parallel>, #tpu.dimension_semantics<arbitrary>], iteration_bounds = array<i64: 2, 1, 1>, scalar_prefetch = 0 : i64, scratch_operands = 0 : i64, tpu.core_type = #tpu.core_type<tc>, window_params = [{transform_indices = @transform_0, window_bounds = array<i64: 1, 4, 32, 128>}, {transform_indices = @transform_1, window_bounds = array<i64: 1, 1, 32, 128>}, {transform_indices = @transform_2, window_bounds = array<i64: 1, 1, 2, 4>}]} {
    %c0_i32 = arith.constant 0 : i32
    %0 = arith.cmpi eq, %arg2, %c0_i32 : i32
    %1 = arith.extui %0 : i1 to i32
    %c0_i32_0 = arith.constant 0 : i32
    %2 = arith.cmpi ne, %1, %c0_i32_0 : i32
    scf.if %2 {
      %cst_20 = arith.constant 0.000000e+00 : f32
      %24 = vector.broadcast %cst_20 : f32 to vector<1x1x2x4xf32>
      %c0_21 = arith.constant 0 : index
      %c0_22 = arith.constant 0 : index
      %c0_23 = arith.constant 0 : index
      %c0_24 = arith.constant 0 : index
      %25 = vector.load %arg5[%c0_21, %c0_22, %c0_23, %c0_24] : memref<1x1x2x4xf32, #tpu.memory_space<vmem>>, vector<1x1x2x4xf32>
      tpu.vector_store %arg5[%c0_21, %c0_22, %c0_23, %c0_24], %24 {strides = array<i32>} : memref<1x1x2x4xf32, #tpu.memory_space<vmem>>, vector<1x1x2x4xf32>,
    } else {
    }
    %c0 = arith.constant 0 : index
    %c0_1 = arith.constant 0 : index
    %c0_2 = arith.constant 0 : index
    %c0_3 = arith.constant 0 : index
    %3 = vector.load %arg3[%c0, %c0_1, %c0_2, %c0_3] : memref<1x4x32x128xf32, #tpu.memory_space<vmem>>, vector<1x4x32x128xf32>
    %4 = vector.shape_cast %3 : vector<1x4x32x128xf32> to vector<4x32x128xf32>
    %c0_4 = arith.constant 0 : index
    %c0_5 = arith.constant 0 : index
    %c0_6 = arith.constant 0 : index
    %c0_7 = arith.constant 0 : index
    %5 = vector.load %arg4[%c0_4, %c0_5, %c0_6, %c0_7] : memref<1x1x32x128xi8, #tpu.memory_space<vmem>>, vector<1x1x32x128xi8>
    %6 = vector.shape_cast %5 : vector<1x1x32x128xi8> to vector<1x32x128xi8>
    %7 = arith.extsi %6 : vector<1x32x128xi8> to vector<1x32x128xi32>
    %8 = tpu.iota {dimensions = array<i32: 0>} : vector<4x32x128xi32>
    %9 = vector.broadcast %7 : vector<1x32x128xi32> to vector<4x32x128xi32>
    %10 = arith.cmpi eq, %8, %9 : vector<4x32x128xi32>
    %cst = arith.constant 0.000000e+00 : f32
    %11 = vector.broadcast %cst : f32 to vector<4x32x128xf32>
    %12 = arith.select %10, %4, %11 : vector<4x32x128xi1>, vector<4x32x128xf32>
    %cst_8 = arith.constant dense<0.000000e+00> : vector<4x32xf32>
    %13 = vector.multi_reduction <add>, %12, %cst_8 [2] : vector<4x32x128xf32> to vector<4x32xf32>
    %cst_9 = arith.constant dense<0.000000e+00> : vector<4xf32>
    %14 = vector.multi_reduction <add>, %13, %cst_9 [1] : vector<4x32xf32> to vector<4xf32>
    %cst_10 = arith.constant dense<0.000000e+00> : vector<4x32xf32>
    %15 = vector.multi_reduction <add>, %4, %cst_10 [2] : vector<4x32x128xf32> to vector<4x32xf32>
    %cst_11 = arith.constant dense<0.000000e+00> : vector<4xf32>
    %16 = vector.multi_reduction <add>, %15, %cst_11 [1] : vector<4x32xf32> to vector<4xf32>
    %17 = vector.shape_cast %14 : vector<4xf32> to vector<1x4xf32>
    %18 = vector.shape_cast %16 : vector<4xf32> to vector<1x4xf32>
    %19 = tpu.concatenate %17, %18 in 0 : vector<1x4xf32>, vector<1x4xf32> -> vector<2x4xf32>
    %20 = vector.shape_cast %19 : vector<2x4xf32> to vector<1x1x2x4xf32>
    %c0_12 = arith.constant 0 : index
    %c0_13 = arith.constant 0 : index
    %c0_14 = arith.constant 0 : index
    %c0_15 = arith.constant 0 : index
    %21 = vector.load %arg5[%c0_12, %c0_13, %c0_14, %c0_15] : memref<1x1x2x4xf32, #tpu.memory_space<vmem>>, vector<1x1x2x4xf32>
    %22 = arith.addf %21, %20 : vector<1x1x2x4xf32>
    %c0_16 = arith.constant 0 : index
    %c0_17 = arith.constant 0 : index
    %c0_18 = arith.constant 0 : index
    %c0_19 = arith.constant 0 : index
    %23 = vector.load %arg5[%c0_16, %c0_17, %c0_18, %c0_19] : memref<1x1x2x4xf32, #tpu.memory_space<vmem>>, vector<1x1x2x4xf32>
    tpu.vector_store %arg5[%c0_16, %c0_17, %c0_18, %c0_19], %22 {strides = array<i32>} : memref<1x1x2x4xf32, #tpu.memory_space<vmem>>, vector<1x1x2x4xf32>,
    return
  }
  func.func @transform_0(%arg0: i32, %arg1: i32, %arg2: i32) -> (i32, i32, i32, i32) {
    %c1_i32 = arith.constant 1 : i32
    %0 = arith.muli %arg1, %c1_i32 : i32
    %1 = arith.addi %0, %arg2 : i32
    %c0_i32 = arith.constant 0 : i32
    %c0_i32_0 = arith.constant 0 : i32
    %c0_i32_1 = arith.constant 0 : i32
    return %arg0, %c0_i32, %1, %c0_i32_0 : i32, i32, i32, i32
  }
  func.func @transform_1(%arg0: i32, %arg1: i32, %arg2: i32) -> (i32, i32, i32, i32) {
    %c1_i32 = arith.constant 1 : i32
    %0 = arith.muli %arg1, %c1_i32 : i32
    %1 = arith.addi %0, %arg2 : i32
    %c0_i32 = arith.constant 0 : i32
    %c0_i32_0 = arith.constant 0 : i32
    %c0_i32_1 = arith.constant 0 : i32
    return %arg0, %c0_i32, %1, %c0_i32_0 : i32, i32, i32, i32
  }
  func.func @transform_2(%arg0: i32, %arg1: i32, %arg2: i32) -> (i32, i32, i32, i32) {
    %c0_i32 = arith.constant 0 : i32
    %c0_i32_0 = arith.constant 0 : i32
    %c0_i32_1 = arith.constant 0 : i32
    return %arg0, %arg1, %c0_i32, %c0_i32_0 : i32, i32, i32, i32
  }
}

</mosaic_0001>

<bundles_post_ra>
// kernel: tpu_custom_call.1
= control target key start
LH: loop header
LB: loop body
LE: loop exit
PB: predicated region body
PF: predicated region fallthrough
CT: control target
= control target key end

     0   :  { %7 = vsyncpa [#allocation3], 0  ;;  %s1113_s0 = inlined_call_operand.hbm [shape: f32[2,4,32,128], index: 0, kind: input, shape index: {}]   ;;  %s1114_s1 = inlined_call_operand.hbm [shape: s8[2,1,32,128], index: 1, kind: input, shape index: {}]   ;;  %s1115_s2 = inlined_call_operand.hbm [shape: f32[2,1,2,4], index: 2, kind: output, shape index: {}]  }
   0x1   :  { %9 = vsyncpa [#allocation3 + $0x1], 0 }
   0x2   :  { %10 = vsyncpa [#allocation6], 0 }
   0x3   :  { %12 = vsyncpa [#allocation6 + $0x1], 0 }
   0x4   :  { %13 = vsyncpa [#allocation4], 0 }
   0x5   :  { %15 = vsyncpa [#allocation4 + $0x1], 0  ;;  %s871_s9 = smov 0   ;;  %s873_s10 = smov 0  }
   0x6   :  { %s875_s11 = smov 0   ;;  %s877_s12 = smov 0  }
   0x7   :  { %s879_s13 = smov 0   ;;  %s881_s14 = smov 0  }
   0x8 LB: > { %s617_s15 = sadd.s32 4294967295, %s851_s14   ;;  %s618_s16 = sadd.s32 4294967294, %s851_s14   ;;  %s851_s14 = sphi %s881_s14, %s21_s14   ;;  %s847_s13 = sphi %s879_s13, %s1125_s13   ;;  %s843_s12 = sphi %s877_s12, %s1124_s12   ;;  %s839_s11 = sphi %s875_s11, %s1123_s11   ;;  %s835_s10 = sphi %s873_s10, %s1122_s10   ;;  %s831_s9 = sphi %s871_s9, %s1121_s9  }
   0x9   : > { %s40_s17 = sadd.s32 1, %s847_s13  ;;  %s51_s18 = sadd.s32 1, %s839_s11 }
   0xa   : > { %p42_p0 = scmp.ge.s32.totalorder %s40_s17, 2  ;;  %p58_p1 = scmp.ne.s32.totalorder %s839_s11, %s835_s10 }
   0xb   : > { %p59_p2 = scmp.eq.s32.totalorder %s851_s14, 0  ;;  %p64_p3 = scmp.ne.s32.totalorder %s835_s10, %s831_s9 }
   0xc   : > { %s1127_s17 = smov (%p42_p0, %s40_s17), 0  ;;  %p65_p5 = scmp.eq.s32.totalorder %s617_s15, 0 }
   0xd   : > { %p912_p4 = por %p59_p2, %p58_p1  ;;  %s46_s20 = ssub.s32 %s847_s13, %s1127_s17 }
   0xe   : > { %p120_p6 = scmp.eq.s32.totalorder %s617_s15, 1  ;;  %p49_p7 = scmp.eq.s32.totalorder %s46_s20, 0 }
   0xf   : > { %p918_p8 = por %p65_p5, %p64_p3  ;;  %p126_p10 = scmp.eq.s32.totalorder %s618_s16, 1 }
  0x10   : > { %p922_p9 = por %p120_p6, %p58_p1  ;;  %p620_p12 = scmp.ge.s32.totalorder %s851_s14, 2 }
  0x11   : > { %s927_s23 = scalar_select %p49_p7, %s839_s11, %s51_s18  }
  0x12   : > { %p929_p11 = por %p126_p10, %p64_p3  ;;  %p652_p13 = scmp.lt.s32.totalorder %s851_s14, 2 }
  0x13   : > { %s146_s25 = sand.u32 1, %s839_s11   ;;  %s634_s27 = sshll.u32 %s847_s13, 7 }
  0x14   : > { %s621_s26 = sshll.u32 %s146_s25, 7  ;;  %s158_s30 = scalar_lea.hbm %s1113_s0, %s634_s27 }
  0x15   : > { %s150_s3 = scalar_lea.vmem [#allocation2], %s621_s26  ;;  %s159_s5 = sshll.u32 %s158_s30, 4  ;;  %s160_s5 = int_to_ptr.hbm [resolvable:$true] %s159_s5 }
  0x16   : > { %s161_s4 = sshll.u32 %s150_s3, 4  ;;  %p942_p0 = pnand %p652_p13, %p912_p4  ;;  %s162_s4 = int_to_ptr.vmem [resolvable:$true] %s161_s4 }
  0x17   : > { %p626_p1 = scmp.ge.s32.totalorder %s851_s14, 1  ;;  %s147_s7 = scalar_lea.sflag [#allocation3], %s146_s25 }
  0x18   : > { %s853_s8 = smov 128   ;;  %s854_s15 = smov 8  }
  0x19   : > { %644 = dma.hbm_to_vmem [thread:$0]  (!%p942_p0), %s160_s5, 2048, %s162_s4, %s147_s7, %s853_s8, %s853_s8, %s854_s15  }
  0x1a   : > { %p190_p2 = scmp.lt.s32.totalorder %s851_s14, 3  ;;  %s624_s16 = sshll.u32 %s146_s25, 3 }
  0x1b   : > { %s625_s18 = sshll.u32 %s847_s13, 3  ;;  %s175_s27 = scalar_lea.vmem [#allocation5], %s624_s16 }
  0x1c   : > { %p191_p3 = pnand %p626_p1, %p190_p2  ;;  %s181_s19 = scalar_lea.hbm %s1114_s1, %s625_s18 }
  0x1d   : > { %s185_s28 = sshll.u32 %s175_s27, 4  ;;  %s183_s29 = sshll.u32 %s181_s19, 4  ;;  %s186_s28 = int_to_ptr.vmem [resolvable:$true] %s185_s28  ;;  %s184_s29 = int_to_ptr.hbm [resolvable:$true] %s183_s29 }
  0x1e   : > { %s172_s30 = scalar_lea.sflag [#allocation6], %s146_s25  ;;  %194 = sbr.rel (%p191_p3) target bundleno = 370 (0x172), region = 28 }
  0x1f   : > { %647 = dma.hbm_to_vmem [thread:$0]  (!%p942_p0), %s184_s29, 128, %s186_s28, %s172_s30  }
  0x20   : > { %s957_s3 = sand.u32 (!%p191_p3), 1, %s835_s10  }
  0x21   : > { %s627_s4 = sshll.u32 (!%p191_p3), %s957_s3, 7  ;;  %s197_s5 = scalar_lea.sflag (!%p191_p3), [#allocation3], %s957_s3 }
  0x22   : > { %s961_s7 = scalar_lea.vmem (!%p191_p3), [#allocation2], %s627_s4 }
  0x23   : > { %818 = dma.done.wait (%p918_p8), %s197_s5, 2048  }
  0x24   : > { %820 = vsyncadd (%p918_p8), %s197_s5, 4294965248  ;;  %s628_s25 = sshll.u32 %s957_s3, 3  ;;  %s207_s6 = scalar_lea.sflag [#allocation6], %s957_s3 }
  0x25   : > { %s210_s8 = scalar_lea.vmem [#allocation5], %s628_s25 }
  0x26   : > { %822 = dma.done.wait (%p918_p8), %s207_s6, 128  }
  0x27   : > { %824 = vsyncadd (%p918_p8), %s207_s6, 4294967168  ;;  %v246_v0 = vld [vmem:[%s961_s7] sm:$0xff]  ;;  %v248_v2 = vld [vmem:[%s961_s7 + $0x10] sm:$0xff]  ;;  %v347_v38 = vlaneseq  ;;  %s629_s21 = sshll.u32 %s957_s3, 1  ;;  %s631_s16 = sshll.u32 %s843_s12, 1 }
  0x28   : > { %v262_v1 = vld [vmem:[%s210_s8] sm:$0xff]  ;;  %394 = vadd.xlane.f32.xlu2 %v246_v0  ;;  %v252_v17 = vld [vmem:[%s961_s7 + $0x30] sm:$0xff]  ;;  %v253_v21 = vld [vmem:[%s961_s7 + $0x38] sm:$0xff]  ;;  %s236_s15 = scalar_lea.vmem [#allocation7], %s629_s21  ;;  %s501_s26 = scalar_lea.hbm %s1115_s2, %s631_s16 }
  0x29   : > { %v975_v3 = vunpack.c.2.s8 %v262_v1  ;;  %v263_v4 = vunpack.c.0.s8 %v262_v1  ;;  %v264_v5 = vunpack.c.1.s8 %v262_v1  ;;  %v251_v6 = vld [vmem:[%s961_s7 + $0x28] sm:$0xff]  ;;  %v250_v10 = vld [vmem:[%s961_s7 + $0x20] sm:$0xff]  ;;  %v266_v20 = vunpack.c.3.s8 %v262_v1  ;;  %v249_v23 = vld [vmem:[%s961_s7 + $0x18] sm:$0xff]  ;;  %s503_s19 = sshll.u32 %s236_s15, 4  ;;  %s505_s27 = sshll.u32 %s501_s26, 4  ;;  %s504_s19 = int_to_ptr.vmem [resolvable:$true] %s503_s19  ;;  %s506_s27 = int_to_ptr.hbm [resolvable:$true] %s505_s27 }
  0x2a   : > { %v247_v11 = vld [vmem:[%s961_s7 + $0x8] sm:$0xff]  ;;  %v254_v16 = vld [vmem:[%s961_s7 + $0x40] sm:$0xff]  ;;  %v256_v28 = vld [vmem:[%s961_s7 + $0x50] sm:$0xff]  ;;  %v997_v41 = vand.u32 127, %v347_v38  ;;  %s490_s12 = scalar_lea.sflag [#allocation4], %s957_s3  ;;  %s779_s28 = sshra.s32 %s506_s27, 4  ;;  %s780_s28 = int_to_ptr.hbm [resolvable:$true] %s779_s28 }
  0x2b   : > { %vm269_vm0 = vcmp.eq.s32.totalorder %v975_v3, 0  ;;  %vm267_vm1 = vcmp.eq.s32.totalorder %v263_v4, 0  ;;  %vm272_vm2 = vcmp.eq.s32.totalorder %v264_v5, 1  ;;  %vm271_vm3 = vcmp.eq.s32.totalorder %v263_v4, 1  ;;  %v255_v14 = vld [vmem:[%s961_s7 + $0x48] sm:$0xff]  ;;  %v258_v27 = vld [vmem:[%s961_s7 + $0x60] sm:$0xff]  ;;  %p786_p7 = scmp.lt.s32.totalorder %s780_s28, %s1115_s2 }
  0x2c   : > { %v285_v7 = vsel %vm269_vm0, %v248_v2, 0.0  ;;  %v283_v8 = vsel %vm267_vm1, %v246_v0, 0.0  ;;  %v288_v9 = vsel %vm272_vm2, %v251_v6, 0.0  ;;  %vm268_vm4 = vcmp.eq.s32.totalorder %v264_v5, 0  ;;  %v259_v25 = vld [vmem:[%s961_s7 + $0x68] sm:$0xff]  ;;  %v257_v31 = vld [vmem:[%s961_s7 + $0x58] sm:$0xff] }
  0x2d   : > { %303 = vadd.xlane.f32.xlu1 %v285_v7  ;;  %299 = vadd.xlane.f32.xlu0 %v283_v8  ;;  %v287_v12 = vsel %vm271_vm3, %v250_v10, 0.0  ;;  %v284_v13 = vsel %vm268_vm4, %v247_v11, 0.0  ;;  %vm276_vm5 = vcmp.eq.s32.totalorder %v264_v5, 2  ;;  %vm275_vm6 = vcmp.eq.s32.totalorder %v263_v4, 2  ;;  %v260_v33 = vld [vmem:[%s961_s7 + $0x70] sm:$0xff]  ;;  %v261_v35 = vld [vmem:[%s961_s7 + $0x78] sm:$0xff] }
  0x2e   : > { %v292_v15 = vsel %vm276_vm5, %v255_v14, 0.0  ;;  %vm273_vm7 = vcmp.eq.s32.totalorder %v975_v3, 1  ;;  %v291_v18 = vsel %vm275_vm6, %v254_v16, 0.0  ;;  %vm274_vm8 = vcmp.eq.s32.totalorder %v266_v20, 1  ;;  %s781_s29 = scalar_lea.hbm %s780_s28, 2  ;;  %s785_s5 = scalar_lea.hbm %s1115_s2, 4 }
  0x2f   : > { %v289_v19 = vsel %vm273_vm7, %v252_v17, 0.0  ;;  %v290_v22 = vsel %vm274_vm8, %v253_v21, 0.0  ;;  %vm270_vm9 = vcmp.eq.s32.totalorder %v266_v20, 0  ;;  %vm280_vm10 = vcmp.eq.s32.totalorder %v264_v5, 3  ;;  %p782_p4 = scmp.ne.s32.totalorder %s780_s28, %s781_s29  ;;  %p787_p8 = scmp.lt.s32.totalorder %s785_s5, %s781_s29 }
  0x30   : > { %309 = vadd.xlane.f32.xlu2 %v288_v9  ;;  %v286_v24 = vsel %vm270_vm9, %v249_v23, 0.0  ;;  %v296_v26 = vsel %vm280_vm10, %v259_v25, 0.0  ;;  %vm279_vm11 = vcmp.eq.s32.totalorder %v263_v4, 3  ;;  %vm277_vm12 = vcmp.eq.s32.totalorder %v975_v3, 2 }
  0x31   : > { %v295_v29 = vsel %vm279_vm11, %v258_v27, 0.0  ;;  %v293_v30 = vsel %vm277_vm12, %v256_v28, 0.0  ;;  %vm278_vm13 = vcmp.eq.s32.totalorder %v266_v20, 2  ;;  %vm281_vm14 = vcmp.eq.s32.totalorder %v975_v3, 3  ;;  %p783_p5 = pnand %p782_p4, %p922_p9  ;;  %p788_p10 = por %p787_p8, %p786_p7 }
  0x32   : > { %v294_v32 = vsel %vm278_vm13, %v257_v31, 0.0  ;;  %v297_v34 = vsel %vm281_vm14, %v260_v33, 0.0  ;;  %vm282_vm15 = vcmp.eq.s32.totalorder %v266_v20, 3  ;;  %v1000_v43 = vadd.s32 4294967288, %v997_v41 }
  0x33   : > { %v298_v36 = vsel %vm282_vm15, %v261_v35, 0.0  ;;  %v1003_v44 = vadd.s32 4294967280, %v997_v41  ;;  %vm352_vm0 = vcmask 130112   ;;  %vm356_vm1 = vcmask 195712   ;;  %p784_p6 = pneg %p783_p5 }
  0x34   : > { %v1011_v61 = vadd.s32 4294967272, %v997_v41  ;;  %vm360_vm2 = vcmask 261312   ;;  %vm383_vm3 = vcmask 1041409   ;;  %vm385_vm4 = vcmask 1042434  }
  0x35   : > { %307 = vadd.xlane.f32.xlu1 %v287_v12  ;;  %301 = vadd.xlane.f32.xlu0 %v284_v13  ;;  %vm387_vm5 = vcmask 1043459   ;;  %vm390_vm6 = vcmask 257024   ;;  %vm244_vm7 = vcmask 25600   ;;  %vm483_vm8 = vcmask 1040384   ;;  %p789_p13 = pnand %p788_p10, %p784_p6 }
  0x38   : > { %404 = vadd.xlane.f32.xlu2 %v251_v6 }
  0x3d   : > { %402 = vadd.xlane.f32.xlu1 %v250_v10  ;;  %396 = vadd.xlane.f32.xlu0 %v247_v11 }
  0x40   : > { %317 = vadd.xlane.f32.xlu2 %v292_v15 }
  0x45   : > { %315 = vadd.xlane.f32.xlu1 %v291_v18  ;;  %311 = vadd.xlane.f32.xlu0 %v289_v19 }
  0x48   : > { %410 = vadd.xlane.f32.xlu2 %v254_v16 }
  0x4d   : > { %406 = vadd.xlane.f32.xlu1 %v252_v17  ;;  %398 = vadd.xlane.f32.xlu0 %v248_v2 }
  0x50   : > { %313 = vadd.xlane.f32.xlu2 %v290_v22 }
  0x55   : > { %305 = vadd.xlane.f32.xlu1 %v286_v24  ;;  %412 = vadd.xlane.f32.xlu0 %v255_v14 }
  0x58   : > { %325 = vadd.xlane.f32.xlu2 %v296_v26 }
  0x5d   : > { %323 = vadd.xlane.f32.xlu1 %v295_v29  ;;  %319 = vadd.xlane.f32.xlu0 %v293_v30 }
  0x60   : > { %414 = vadd.xlane.f32.xlu2 %v256_v28 }
  0x65   : > { %408 = vadd.xlane.f32.xlu1 %v253_v21  ;;  %400 = vadd.xlane.f32.xlu0 %v249_v23 }
  0x68   : > { %321 = vadd.xlane.f32.xlu2 %v294_v32 }
  0x6d   : > { %420 = vadd.xlane.f32.xlu1 %v259_v25  ;;  %418 = vadd.xlane.f32.xlu0 %v258_v27 }
  0x70   : > { %422 = vadd.xlane.f32.xlu2 %v260_v33 }
  0x75   : > { %416 = vadd.xlane.f32.xlu1 %v257_v31  ;;  %327 = vadd.xlane.f32.xlu0 %v297_v34 }
  0x7d   : > { %424 = vadd.xlane.f32.xlu1 %v261_v35  ;;  %329 = vadd.xlane.f32.xlu0 %v298_v36 }
  0x9b   : > { %v995_v37 = vpop.xlane.xlu2 %394 }
  0x9c   : > { %v442_v23 = vperm.slane %v995_v37, %v997_v41 }
  0xa0   : > { %v304_v39 = vpop.xlane.xlu1 %303  ;;  %v300_v40 = vpop.xlane.xlu0 %299 }
  0xa1   : > { %v349_v47 = vperm.slane %v300_v40, %v997_v41  ;;  %v355_v49 = vperm.slane %v304_v39, %v1003_v44 }
  0xa3   : > { %v310_v42 = vpop.xlane.xlu2 %309 }
  0xa4   : > { %v363_v63 = vperm.slane %v310_v42, %v1000_v43 }
  0xa8   : > { %v308_v45 = vpop.xlane.xlu1 %307  ;;  %v302_v46 = vpop.xlane.xlu0 %301 }
  0xa9   : > { %v351_v48 = vperm.slane %v302_v46, %v1000_v43  ;;  %v362_v0 = vperm.slane %v308_v45, %v997_v41 }
  0xab   : > { %v353_v50 = vsel %vm352_vm0, %v351_v48, %v349_v47  ;;  %v405_v51 = vpop.xlane.xlu2 %404  ;;  %v364_v5 = vsel %vm352_vm0, %v363_v63, %v362_v0 }
  0xac   : > { %v357_v52 = vsel %vm356_vm1, %v355_v49, %v353_v50  ;;  %v450_v20 = vperm.slane %v405_v51, %v1000_v43 }
  0xb0   : > { %v403_v53 = vpop.xlane.xlu1 %402  ;;  %v397_v54 = vpop.xlane.xlu0 %396 }
  0xb1   : > { %v449_v21 = vperm.slane %v403_v53, %v997_v41  ;;  %v443_v22 = vperm.slane %v397_v54, %v1000_v43 }
  0xb3   : > { %v318_v55 = vpop.xlane.xlu2 %317  ;;  %v451_v29 = vsel %vm352_vm0, %v450_v20, %v449_v21  ;;  %v444_v30 = vsel %vm352_vm0, %v443_v22, %v442_v23 }
  0xb4   : > { %v370_v24 = vperm.slane %v318_v55, %v1000_v43 }
  0xb8   : > { %v316_v56 = vpop.xlane.xlu1 %315  ;;  %v312_v57 = vpop.xlane.xlu0 %311 }
  0xb9   : > { %v365_v1 = vperm.slane %v312_v57, %v1003_v44  ;;  %v369_v25 = vperm.slane %v316_v56, %v997_v41 }
  0xbb   : > { %v411_v58 = vpop.xlane.xlu2 %410  ;;  %v366_v7 = vsel %vm356_vm1, %v365_v1, %v364_v5  ;;  %v371_v39 = vsel %vm352_vm0, %v370_v24, %v369_v25 }
  0xbc   : > { %v456_v31 = vperm.slane %v411_v58, %v997_v41 }
  0xc0   : > { %v407_v59 = vpop.xlane.xlu1 %406  ;;  %v399_v60 = vpop.xlane.xlu0 %398 }
  0xc1   : > { %v452_v26 = vperm.slane %v407_v59, %v1003_v44  ;;  %v445_v32 = vperm.slane %v399_v60, %v1003_v44 }
  0xc3   : > { %v314_v62 = vpop.xlane.xlu2 %313  ;;  %v453_v40 = vsel %vm356_vm1, %v452_v26, %v451_v29  ;;  %v446_v50 = vsel %vm356_vm1, %v445_v32, %v444_v30 }
  0xc4   : > { %v367_v2 = vperm.slane %v314_v62, %v1011_v61 }
  0xc6   : > { %v368_v8 = vsel %vm360_vm2, %v367_v2, %v366_v7 }
  0xc8   : > { %v306_v3 = vpop.xlane.xlu1 %305  ;;  %v413_v4 = vpop.xlane.xlu0 %412 }
  0xc9   : > { %v359_v6 = vperm.slane %v306_v3, %v1011_v61  ;;  %v457_v33 = vperm.slane %v413_v4, %v1000_v43 }
  0xcb   : > { %v361_v9 = vsel %vm360_vm2, %v359_v6, %v357_v52  ;;  %v326_v11 = vpop.xlane.xlu2 %325  ;;  %v458_v51 = vsel %vm352_vm0, %v457_v33, %v456_v31 }
  0xcc   : > { %v1023_v10 = vsel %vm383_vm3, %v368_v8, %v361_v9  ;;  %v377_v46 = vperm.slane %v326_v11, %v1000_v43 }
  0xd0   : > { %v324_v12 = vpop.xlane.xlu1 %323  ;;  %v320_v13 = vpop.xlane.xlu0 %319 }
  0xd1   : > { %v372_v34 = vperm.slane %v320_v13, %v1003_v44  ;;  %v376_v47 = vperm.slane %v324_v12, %v997_v41 }
  0xd3   : > { %v415_v14 = vpop.xlane.xlu2 %414  ;;  %v373_v54 = vsel %vm356_vm1, %v372_v34, %v371_v39  ;;  %v378_v62 = vsel %vm352_vm0, %v377_v46, %v376_v47 }
  0xd4   : > { %v459_v35 = vperm.slane %v415_v14, %v1003_v44 }
  0xd6   : > { %v460_v55 = vsel %vm356_vm1, %v459_v35, %v458_v51 }
  0xd8   : > { %v409_v15 = vpop.xlane.xlu1 %408  ;;  %v401_v16 = vpop.xlane.xlu0 %400 }
  0xd9   : > { %v454_v36 = vperm.slane %v409_v15, %v1011_v61  ;;  %v447_v37 = vperm.slane %v401_v16, %v1011_v61 }
  0xdb   : > { %v322_v19 = vpop.xlane.xlu2 %321  ;;  %v455_v56 = vsel %vm360_vm2, %v454_v36, %v453_v40  ;;  %v448_v57 = vsel %vm360_vm2, %v447_v37, %v446_v50 }
  0xdc   : > { %v374_v42 = vperm.slane %v322_v19, %v1011_v61  ;;  %v470_v3 = vsel %vm383_vm3, %v455_v56, %v448_v57 }
  0xe0   : > { %v421_v17 = vpop.xlane.xlu1 %420  ;;  %v419_v18 = vpop.xlane.xlu0 %418 }
  0xe1   : > { %v464_v48 = vperm.slane %v421_v17, %v1000_v43  ;;  %v463_v49 = vperm.slane %v419_v18, %v997_v41  ;;  %v375_v43 = vsel %vm360_vm2, %v374_v42, %v373_v54 }
  0xe2   : > { %v386_v7 = vsel %vm385_vm4, %v375_v43, %v1023_v10 }
  0xe3   : > { %v423_v38 = vpop.xlane.xlu2 %422 }
  0xe4   : > { %v466_v52 = vperm.slane %v423_v38, %v1003_v44 }
  0xe8   : > { %v417_v27 = vpop.xlane.xlu1 %416  ;;  %v328_v28 = vpop.xlane.xlu0 %327 }
  0xe9   : > { %v461_v45 = vperm.slane %v417_v27, %v1011_v61  ;;  %v379_v53 = vperm.slane %v328_v28, %v1003_v44  ;;  %v465_v44 = vsel %vm352_vm0, %v464_v48, %v463_v49 }
  0xea   : > { %v467_v1 = vsel %vm356_vm1, %v466_v52, %v465_v44 }
  0xeb   : > { %v462_v58 = vsel %vm360_vm2, %v461_v45, %v460_v55  ;;  %v380_v2 = vsel %vm356_vm1, %v379_v53, %v378_v62 }
  0xec   : > { %v471_v5 = vsel %vm385_vm4, %v462_v58, %v470_v3 }
  0xf0   : > { %v425_v59 = vpop.xlane.xlu1 %424  ;;  %v330_v60 = vpop.xlane.xlu0 %329 }
  0xf1   : > { %v468_v63 = vperm.slane %v425_v59, %v1011_v61  ;;  %v381_v0 = vperm.slane %v330_v60, %v1011_v61  ;;  %v855_v61 = vmov 0.0  }
  0xf2   : > { %245 = vst.msk [vmem:[%s236_s15] sm:$0x3] %vm244_vm7, %v855_v61 }
  0xf3   : > { %v469_v4 = vsel %vm360_vm2, %v468_v63, %v467_v1  ;;  %v382_v6 = vsel %vm360_vm2, %v381_v0, %v380_v2 }
  0xf4   : > { %v472_v8 = vsel %vm387_vm5, %v469_v4, %v471_v5  ;;  %v388_v9 = vsel %vm387_vm5, %v382_v6, %v386_v7 }
  0xf5   : > { %v474_v11 = vsel %vm390_vm6, %v472_v8, 0.0  ;;  %v391_v12 = vsel %vm390_vm6, %v388_v9, 0.0 }
  0xf6   : > { %475 = vadd.xlane.f32.xlu0 %v474_v11  ;;  %392 = vadd.xlane.f32.xlu2 %v391_v12 }
  0xf9   : > { %v485_v16 = vld [vmem:[%s236_s15] sm:$0x3] }
 0x169   : > { %v393_v13 = vpop.xlane.xlu2 %392  ;;  %v476_v10 = vpop.xlane.xlu0 %475 }
 0x16a   : > { %v478_v14 = vperm.slane %v393_v13, %v997_v41  ;;  %v481_v15 = vperm.slane %v476_v10, %v997_v41 }
 0x16c   : > { %v484_v17 = vsel %vm483_vm8, %v478_v14, %v481_v15 }
 0x16d   : > { %v486_v18 = vadd.f32 %v485_v16, %v484_v17 }
 0x16f   : > { %488 = vst.msk [vmem:[%s236_s15] sm:$0x3] %vm244_vm7, %v486_v18 }
 0x170   : > { %792 = shalt.err (!%p789_p13)
}
 0x171   : > { %639 = dma.vmem_to_hbm [thread:$0]  (%p922_p9), %s504_s19, 32, %s506_s27, %s490_s12  }
 0x172 PF: > { %s517_s3 = sand.u32 1, %s831_s9   ;;  %p649_p0 = pnand %p620_p12, %p929_p11 }
 0x173   : > { %s518_s6 = scalar_lea.sflag [#allocation4], %s517_s3 }
 0x174   : > { %p650_p1 = pneg %p649_p0 }
 0x176   : > { %826 = dma.done.wait (%p650_p1), %s518_s6, 32  }
 0x177   : > { %828 = vsyncadd (%p650_p1), %s518_s6, 4294967264  ;;  %s21_s14 = sadd.s32 1, %s851_s14   ;;  %s1121_s9 = smov %s835_s10 }
 0x178   : > { %p18_p2 = scmp.ge.s32.totalorder %s21_s14, 4   ;;  %s1122_s10 = smov %s839_s11 }
 0x179   : > { %s1123_s11 = smov %s927_s23  ;;  %s1124_s12 = smov %s847_s13 }
 0x17a   : > { %s1125_s13 = smov %s1127_s17  ;;  %20 = sbr.rel (!%p18_p2) target bundleno = 8 (0x8), region = 90 }
 0x17f   :  { %524 = vsyncpa [#allocation3], 1 }
 0x180   :  { %526 = vsyncpa [#allocation3 + $0x1], 1 }
 0x181   :  { %527 = vsyncpa [#allocation6], 1 }
 0x182   :  { %529 = vsyncpa [#allocation6 + $0x1], 1 }
 0x183   :  { %530 = vsyncpa [#allocation4], 1 }
 0x184   :  { %532 = vsyncpa [#allocation4 + $0x1], 1 }

</bundles_post_ra>
